<compile_context>
chip_gen: v6e
topology: v6e:2x2x1
jax: 0.10.0
libtpu: 0.0.40
codegen_flags: <defaults>
</compile_context>

<pallas_src>
import functools

import jax
import jax.numpy as jnp
import numpy as np
from jax import lax
from jax.experimental import pallas as pl
from jax.experimental.pallas import tpu as pltpu

OUT_CHANNELS = 256
BN_EPS = 1e-5


# ----------------------------------------------------------------------------
# Kernel 1 (tiny): pooling-branch projection bias.
#   bias[b] = ReLU(mean_hw(x[b]) @ W_pool_folded + shift_pool) @ P_pool
#   where P_pool = proj_w[1024:1280] (BN scale folded).  Shape (B, 1, 256).
# ----------------------------------------------------------------------------
def _pool_bias_kernel(x_ref, wp_ref, sp_ref, pj_ref, o_ref):
    x = x_ref[0]                                           # (H, W, Cin) f32
    cin = x.shape[-1]
    xm = jnp.mean(x.reshape(-1, cin), axis=0, keepdims=True)      # (1, Cin) f32
    pooled = jnp.dot(xm.astype(jnp.bfloat16), wp_ref[...],
                     preferred_element_type=jnp.float32) + sp_ref[...]
    pooled = jnp.maximum(pooled, 0.0)                      # (1, 256) f32
    bias = jnp.dot(pooled.astype(jnp.bfloat16), pj_ref[...],
                   preferred_element_type=jnp.float32)     # (1, 256) f32
    o_ref[...] = bias.reshape(1, 1, OUT_CHANNELS).astype(o_ref.dtype)


# ----------------------------------------------------------------------------
# Kernel 2: fully fused ASPP.
#   Per (batch, row-tile): 1x1 branch + 3 dilated 3x3 branches (im2col, one
#   matmul each, BN-folded bf16 weights) + fused projection + pool bias + ReLU.
# ----------------------------------------------------------------------------
def _fused_aspp_kernel(x_ref, w0_ref, s0_ref, wd_ref, sd_ref, wproj_ref,
                       sproj_ref, pb_ref, o_ref, *, W, th, dmax, rates):
    r = pl.program_id(1)
    cin = x_ref.shape[-1]
    hs = th + 2 * dmax                       # tile rows + max halo
    row0 = pl.multiple_of(r * th, th)        # dynamic start on the untiled H axis

    # Rows [row0, row0+hs) of the dmax-padded image cover this tile + halo.
    slab = x_ref[0, pl.ds(row0, hs), :, :]                 # (hs, Wp, Cin) bf16

    # Centre window: input of the 1x1 branch and the (ky=1,kx=1) tap of every
    # dilated branch.
    centre = slab[dmax:dmax + th, dmax:dmax + W, :]        # (th, W, Cin)

    sd = sd_ref[...]                                       # (3, 256) f32

    # ---- branch 0: 1x1 conv (BN scale pre-folded) + shift + ReLU -----------
    b0 = jnp.dot(centre.reshape(th * W, cin), w0_ref[...],
                 preferred_element_type=jnp.float32)
    b0 = jnp.maximum(b0 + s0_ref[...], 0.0)                # (th*W, 256) f32
    branches = [b0]

    # ---- branches 1-3: dilated 3x3 conv via in-VMEM im2col, ONE matmul -----
    for j, d in enumerate(rates):
        # One sublane (W) shift per kx; all ky shifts are free leading-axis
        # slices of these columns.
        cols = []
        for kx in range(3):
            c0 = dmax + (kx - 1) * d
            cols.append(slab[:, c0:c0 + W, :])             # (hs, W, Cin)
        taps = []
        for ky in range(3):
            r0 = dmax + (ky - 1) * d
            for kx in range(3):
                if ky == 1 and kx == 1:
                    taps.append(centre)
                else:
                    taps.append(cols[kx][r0:r0 + th, :, :])  # free slice
        patch = jnp.concatenate(taps, axis=-1).reshape(th * W, 9 * cin)  # bf16
        bd = jnp.dot(patch, wd_ref[j], preferred_element_type=jnp.float32)
        bd = jnp.maximum(bd + sd[j:j + 1, :], 0.0)         # (th*W, 256) f32
        branches.append(bd)

    # ---- fused projection: concat(branches) @ proj_w[0:1024] + pool bias ---
    cat = jnp.concatenate(branches, axis=-1).astype(jnp.bfloat16)  # (th*W,1024)
    acc = jnp.dot(cat, wproj_ref[...], preferred_element_type=jnp.float32)
    acc = acc + sproj_ref[...] + pb_ref[0]                 # proj shift + pool bias
    out = jnp.maximum(acc, 0.0)
    # Dropout(0.1): identity in eval mode.
    o_ref[...] = out.reshape(1, th, W, OUT_CHANNELS).astype(o_ref.dtype)


# ----------------------------------------------------------------------------
# ASPP forward (Pallas)
# ----------------------------------------------------------------------------
def aspp_forward(x_nhwc, q, *, row_tile=8):
    B, H, W, Cin = x_nhwc.shape
    rates = q['rates']
    assert len(rates) == 3
    dmax = max(rates)
    th = row_tile if H % row_tile == 0 else H
    rt = H // th
    C = OUT_CHANNELS

    # --- pooling-branch projection bias: (B, 1, 256) -------------------------
    pool_bias = pl.pallas_call(
        _pool_bias_kernel,
        out_shape=jax.ShapeDtypeStruct((B, 1, C), jnp.float32),
        grid_spec=pl.GridSpec(
            grid=(B,),
            in_specs=[
                pl.BlockSpec((1, H, W, Cin), lambda b: (b, 0, 0, 0)),
                pl.BlockSpec((Cin, C), lambda b: (0, 0)),
                pl.BlockSpec((1, C), lambda b: (0, 0)),
                pl.BlockSpec((C, C), lambda b: (0, 0)),
            ],
            out_specs=pl.BlockSpec((1, 1, C), lambda b: (b, 0, 0)),
        ),
        compiler_params=pltpu.CompilerParams(dimension_semantics=("parallel",)),
    )(x_nhwc, q['wpool'], q['spool'], q['proj_pool'])

    # --- pad once with the max dilation; bf16 halves DMA bytes --------------
    x_pad = jnp.pad(x_nhwc, ((0, 0), (dmax, dmax), (dmax, dmax), (0, 0))
                    ).astype(jnp.bfloat16)
    Hp, Wp = H + 2 * dmax, W + 2 * dmax

    kern = functools.partial(_fused_aspp_kernel, W=W, th=th, dmax=dmax,
                             rates=rates)
    out = pl.pallas_call(
        kern,
        out_shape=jax.ShapeDtypeStruct((B, H, W, C), jnp.float32),
        grid_spec=pl.GridSpec(
            grid=(B, rt),
            in_specs=[
                # padded input: block index constant over r -> one DMA per batch
                pl.BlockSpec((1, Hp, Wp, Cin), lambda b, r: (b, 0, 0, 0)),
                pl.BlockSpec((Cin, C), lambda b, r: (0, 0)),          # w0 (folded, bf16)
                pl.BlockSpec((1, C), lambda b, r: (0, 0)),            # shift0
                pl.BlockSpec(q['wd'].shape, lambda b, r: (0, 0, 0)),  # (3,9*Cin,256)
                pl.BlockSpec(q['sd'].shape, lambda b, r: (0, 0)),     # (3,256)
                pl.BlockSpec((4 * C, C), lambda b, r: (0, 0)),        # proj[:1024]
                pl.BlockSpec((1, C), lambda b, r: (0, 0)),            # proj shift
                pl.BlockSpec((1, 1, C), lambda b, r: (b, 0, 0)),      # pool bias
            ],
            out_specs=pl.BlockSpec((1, th, W, C), lambda b, r: (b, r, 0, 0)),
        ),
        compiler_params=pltpu.CompilerParams(
            dimension_semantics=("parallel", "parallel")),
    )(x_pad, q['w0'], q['s0'], q['wd'], q['sd'],
      q['proj_main'], q['proj_shift'], pool_bias)
    return out


# ----------------------------------------------------------------------------
# Parameter prep: fold BN(eval) scale into conv weights, cast MXU operands to
# bf16, pack dilated-branch weights tap-major for the im2col matmul.
# ----------------------------------------------------------------------------
def prepare_params(p):
    C = OUT_CHANNELS
    q = {'rates': p['rates']}
    q['w0'] = (p['b0_w'] * p['b0_scale'][None, :]).astype(jnp.bfloat16)
    q['s0'] = p['b0_shift'].reshape(1, C)
    wds, sds = [], []
    for i in range(3):
        w_hwio = p[f'b{i+1}_w_hwio']                         # (3,3,Cin,256) f32
        cin = w_hwio.shape[2]
        wf = w_hwio.reshape(9 * cin, C) * p[f'b{i+1}_scale'][None, :]
        wds.append(wf.astype(jnp.bfloat16))
        sds.append(p[f'b{i+1}_shift'])
    q['wd'] = jnp.stack(wds, axis=0)                          # (3, 9*Cin, 256)
    q['sd'] = jnp.stack(sds, axis=0)                          # (3, 256)
    q['wpool'] = (p['pool_w'] * p['pool_scale'][None, :]).astype(jnp.bfloat16)
    q['spool'] = p['pool_shift'].reshape(1, C)
    projf = p['proj_w'] * p['proj_scale'][None, :]            # (1280, 256)
    q['proj_main'] = projf[:4 * C].astype(jnp.bfloat16)       # branches 0-3
    q['proj_pool'] = projf[4 * C:].astype(jnp.bfloat16)       # pooling branch
    q['proj_shift'] = p['proj_shift'].reshape(1, C)
    return q


# ----------------------------------------------------------------------------
# Plain-JAX f32 reference (module semantics, un-folded parameters)
# ----------------------------------------------------------------------------
def _bn_relu(y, scale, shift):
    return jnp.maximum(y * scale + shift, 0.0)


def aspp_reference(x_nhwc, p):
    B, H, W, Cin = x_nhwc.shape
    outs = [_bn_relu(jnp.einsum('bhwc,cd->bhwd', x_nhwc, p['b0_w']),
                     p['b0_scale'], p['b0_shift'])]
    for i, d in enumerate(p['rates']):
        y = lax.conv_general_dilated(
            x_nhwc, p[f'b{i+1}_w_hwio'], window_strides=(1, 1),
            padding=[(d, d), (d, d)], rhs_dilation=(d, d),
            dimension_numbers=('NHWC', 'HWIO', 'NHWC'))
        outs.append(_bn_relu(y, p[f'b{i+1}_scale'], p[f'b{i+1}_shift']))
    xm = jnp.mean(x_nhwc, axis=(1, 2))
    yp = _bn_relu(xm @ p['pool_w'], p['pool_scale'], p['pool_shift'])
    outs.append(jnp.broadcast_to(yp[:, None, None, :], (B, H, W, OUT_CHANNELS)))
    cat = jnp.concatenate(outs, axis=-1)
    return _bn_relu(jnp.einsum('bhwc,cd->bhwd', cat, p['proj_w']),
                    p['proj_scale'], p['proj_shift'])


# ----------------------------------------------------------------------------
# Deterministic parameter init (shapes follow the PyTorch module __init__)
# ----------------------------------------------------------------------------
def init_params(key, in_channels, rates):
    C = OUT_CHANNELS
    p = {'rates': tuple(int(r) for r in rates)}

    def bn(k):
        k1, k2, k3, k4 = jax.random.split(k, 4)
        gamma = jax.random.uniform(k1, (C,), minval=0.5, maxval=1.5)
        beta = 0.1 * jax.random.normal(k2, (C,))
        mean = 0.1 * jax.random.normal(k3, (C,))
        var = jax.random.uniform(k4, (C,), minval=0.5, maxval=1.5)
        scale = gamma / jnp.sqrt(var + BN_EPS)
        shift = beta - mean * scale
        return scale.astype(jnp.float32), shift.astype(jnp.float32)

    keys = jax.random.split(key, 16)
    w0 = 0.1 * jax.random.normal(keys[0], (C, in_channels, 1, 1))
    p['b0_w'] = w0[:, :, 0, 0].T.astype(jnp.float32)              # (Cin, 256)
    p['b0_scale'], p['b0_shift'] = bn(keys[1])
    for i, _ in enumerate(rates):
        w = 0.1 * jax.random.normal(keys[2 + 2 * i], (C, in_channels, 3, 3))
        p[f'b{i+1}_w_hwio'] = jnp.transpose(w, (2, 3, 1, 0)).astype(jnp.float32)
        p[f'b{i+1}_scale'], p[f'b{i+1}_shift'] = bn(keys[3 + 2 * i])
    wp = 0.1 * jax.random.normal(keys[8], (C, in_channels, 1, 1))
    p['pool_w'] = wp[:, :, 0, 0].T.astype(jnp.float32)
    p['pool_scale'], p['pool_shift'] = bn(keys[9])
    wproj = 0.05 * jax.random.normal(keys[10], (C, 5 * C, 1, 1))
    p['proj_w'] = wproj[:, :, 0, 0].T.astype(jnp.float32)         # (1280, 256)
    p['proj_scale'], p['proj_shift'] = bn(keys[11])
    return p


if __name__ == "__main__":
    root = jax.random.PRNGKey(0)
    kp, kx = jax.random.split(root)

    B, Cin, H, W = 2, 4, 16, 16
    rates = (2, 4, 6)        # scaled-down atrous rates to fit the 16x16 test map

    raw = init_params(kp, Cin, rates)
    fused_params = prepare_params(raw)

    x_nchw = jax.random.normal(kx, (B, Cin, H, W), jnp.float32)   # PyTorch NCHW
    x_nhwc = jnp.transpose(x_nchw, (0, 2, 3, 1))                  # kernel layout

    out = jax.block_until_ready(aspp_forward(x_nhwc, fused_params))

    ref = aspp_reference(x_nhwc, raw)
    # bf16 MXU operands vs. f32 reference -> loose-ish tolerance.
    np.testing.assert_allclose(np.asarray(out), np.asarray(ref),
                               rtol=5e-2, atol=5e-2)
    assert out.shape == (B, H, W, OUT_CHANNELS)
    print("KERNEL_OK")
</pallas_src>

<mosaic_0001>
module attributes {stable_mosaic.version = 11 : i64} {
  func.func @_pool_bias_kernel(%arg0: i32, %arg1: memref<1x16x16x4xf32, #tpu.memory_space<vmem>>, %arg2: memref<4x256xbf16, #tpu.memory_space<vmem>>, %arg3: memref<1x256xf32, #tpu.memory_space<vmem>>, %arg4: memref<256x256xbf16, #tpu.memory_space<vmem>>, %arg5: memref<1x1x256xf32, #tpu.memory_space<vmem>>) attributes {dimension_semantics = [#tpu.dimension_semantics<parallel>], iteration_bounds = array<i64: 2>, scalar_prefetch = 0 : i64, scratch_operands = 0 : i64, tpu.core_type = #tpu.core_type<tc>, window_params = [{transform_indices = @transform_0, window_bounds = array<i64: 1, 16, 16, 4>}, {pipeline_mode = #tpu.pipeline_mode<synchronous>, transform_indices = @transform_1, window_bounds = array<i64: 4, 256>}, {pipeline_mode = #tpu.pipeline_mode<synchronous>, transform_indices = @transform_2, window_bounds = array<i64: 1, 256>}, {pipeline_mode = #tpu.pipeline_mode<synchronous>, transform_indices = @transform_3, window_bounds = array<i64: 256, 256>}, {transform_indices = @transform_4, window_bounds = array<i64: 1, 1, 256>}]} {
    %c0 = arith.constant 0 : index
    %c0_0 = arith.constant 0 : index
    %c0_1 = arith.constant 0 : index
    %c0_2 = arith.constant 0 : index
    %0 = vector.load %arg1[%c0, %c0_0, %c0_1, %c0_2] : memref<1x16x16x4xf32, #tpu.memory_space<vmem>>, vector<1x16x16x4xf32>
    %1 = vector.shape_cast %0 : vector<1x16x16x4xf32> to vector<16x16x4xf32>
    %2 = vector.shape_cast %1 : vector<16x16x4xf32> to vector<256x4xf32>
    %cst = arith.constant dense<0.000000e+00> : vector<4xf32>
    %3 = vector.multi_reduction <add>, %2, %cst [0] : vector<256x4xf32> to vector<4xf32>
    %4 = vector.shape_cast %3 : vector<4xf32> to vector<1x4xf32>
    %cst_3 = arith.constant 2.560000e+02 : f32
    %5 = vector.broadcast %cst_3 : f32 to vector<1x4xf32>
    %6 = arith.divf %4, %5 : vector<1x4xf32>
    %7 = arith.truncf %6 : vector<1x4xf32> to vector<1x4xbf16>
    %c0_4 = arith.constant 0 : index
    %c0_5 = arith.constant 0 : index
    %8 = vector.load %arg2[%c0_4, %c0_5] : memref<4x256xbf16, #tpu.memory_space<vmem>>, vector<4x256xbf16>
    %cst_6 = arith.constant dense<0.000000e+00> : vector<1x256xf32>
    %9 = tpu.matmul %7, %8, %cst_6 {dimension_numbers = #tpu.dot_dimension_numbers<[1], [0], [0], [1], [0, 0, 1, 1], [], []>} : vector<1x4xbf16>, vector<4x256xbf16>, vector<1x256xf32> -> vector<1x256xf32>
    %c0_7 = arith.constant 0 : index
    %c0_8 = arith.constant 0 : index
    %10 = vector.load %arg3[%c0_7, %c0_8] : memref<1x256xf32, #tpu.memory_space<vmem>>, vector<1x256xf32>
    %11 = arith.addf %9, %10 : vector<1x256xf32>
    %cst_9 = arith.constant 0.000000e+00 : f32
    %12 = vector.broadcast %cst_9 : f32 to vector<1x256xf32>
    %13 = arith.maximumf %11, %12 : vector<1x256xf32>
    %14 = arith.truncf %13 : vector<1x256xf32> to vector<1x256xbf16>
    %c0_10 = arith.constant 0 : index
    %c0_11 = arith.constant 0 : index
    %15 = vector.load %arg4[%c0_10, %c0_11] : memref<256x256xbf16, #tpu.memory_space<vmem>>, vector<256x256xbf16>
    %cst_12 = arith.constant dense<0.000000e+00> : vector<1x256xf32>
    %16 = tpu.matmul %14, %15, %cst_12 {dimension_numbers = #tpu.dot_dimension_numbers<[1], [0], [0], [1], [0, 0, 1, 1], [], []>} : vector<1x256xbf16>, vector<256x256xbf16>, vector<1x256xf32> -> vector<1x256xf32>
    %17 = vector.shape_cast %16 : vector<1x256xf32> to vector<1x1x256xf32>
    %c0_13 = arith.constant 0 : index
    %c0_14 = arith.constant 0 : index
    %c0_15 = arith.constant 0 : index
    %18 = vector.load %arg5[%c0_13, %c0_14, %c0_15] : memref<1x1x256xf32, #tpu.memory_space<vmem>>, vector<1x1x256xf32>
    tpu.vector_store %arg5[%c0_13, %c0_14, %c0_15], %17 {strides = array<i32>} : memref<1x1x256xf32, #tpu.memory_space<vmem>>, vector<1x1x256xf32>,
    return
  }
  func.func @transform_0(%arg0: i32) -> (i32, i32, i32, i32) {
    %c0_i32 = arith.constant 0 : i32
    %c0_i32_0 = arith.constant 0 : i32
    %c0_i32_1 = arith.constant 0 : i32
    %c0_i32_2 = arith.constant 0 : i32
    return %arg0, %c0_i32, %c0_i32_0, %c0_i32_1 : i32, i32, i32, i32
  }
  func.func @transform_1(%arg0: i32) -> (i32, i32) {
    %c0_i32 = arith.constant 0 : i32
    %c0_i32_0 = arith.constant 0 : i32
    %c0_i32_1 = arith.constant 0 : i32
    return %c0_i32, %c0_i32_0 : i32, i32
  }
  func.func @transform_2(%arg0: i32) -> (i32, i32) {
    %c0_i32 = arith.constant 0 : i32
    %c0_i32_0 = arith.constant 0 : i32
    %c0_i32_1 = arith.constant 0 : i32
    return %c0_i32, %c0_i32_0 : i32, i32
  }
  func.func @transform_3(%arg0: i32) -> (i32, i32) {
    %c0_i32 = arith.constant 0 : i32
    %c0_i32_0 = arith.constant 0 : i32
    %c0_i32_1 = arith.constant 0 : i32
    return %c0_i32, %c0_i32_0 : i32, i32
  }
  func.func @transform_4(%arg0: i32) -> (i32, i32, i32) {
    %c0_i32 = arith.constant 0 : i32
    %c0_i32_0 = arith.constant 0 : i32
    %c0_i32_1 = arith.constant 0 : i32
    return %arg0, %c0_i32, %c0_i32_0 : i32, i32, i32
  }
}

</mosaic_0001>

<bundles_post_ra>
// kernel: tpu_custom_call.1
= control target key start
LH: loop header
LB: loop body
LE: loop exit
PB: predicated region body
PF: predicated region fallthrough
CT: control target
= control target key end

     0   :  { %9 = vsyncpa [#allocation3], 0  ;;  %s1193_s0 = inlined_call_operand.vmem [shape: f32[2,16,16,4], index: 0, kind: input, shape index: {}]   ;;  %s1194_s1 = inlined_call_operand.vmem [shape: bf16[4,256], index: 1, kind: input, shape index: {}]   ;;  %s1195_s2 = inlined_call_operand.vmem [shape: f32[1,256], index: 2, kind: input, shape index: {}]   ;;  %s1196_s3 = inlined_call_operand.vmem [shape: bf16[256,256], index: 3, kind: input, shape index: {}]   ;;  %s1197_s4 = inlined_call_operand.hbm [shape: f32[2,1,256], index: 4, kind: output, shape index: {}]  }
   0x1   :  { %11 = vsyncpa [#allocation3 + $0x1], 0  ;;  %s937_s15 = smov 0   ;;  %s939_s16 = smov 0  }
   0x2   :  { %s941_s17 = smov 0   ;;  %s943_s18 = smov 0  }
   0x3 LB: > { %s958_s19 = sadd.s32 4294967295, %s907_s18   ;;  %s709_s20 = sadd.s32 4294967294, %s907_s18   ;;  %s907_s18 = sphi %s943_s18, %s1203_s18   ;;  %s903_s17 = sphi %s941_s17, %s1202_s17   ;;  %s899_s16 = sphi %s939_s16, %s1201_s16   ;;  %s895_s15 = sphi %s937_s15, %s1200_s15  }
   0x4   : > { %s962_s21 = sadd.s32 1, %s907_s18   ;;  %s113_s22 = sadd.s32 1, %s903_s17 }
   0x5   : > { %s110_s23 = ssub.s32 %s907_s18, %s962_s21  ;;  %p123_p0 = scmp.ne.s32.totalorder %s903_s17, %s899_s16 }
   0x6   : > { %p111_p1 = scmp.eq.s32.totalorder %s110_s23, 0  ;;  %p124_p2 = scmp.eq.s32.totalorder %s958_s19, 1 }
   0x7   : > { %p129_p3 = scmp.ne.s32.totalorder %s899_s16, %s895_s15  ;;  %p130_p4 = scmp.eq.s32.totalorder %s709_s20, 1 }
   0x8   : > { %s973_s24 = scalar_select %p111_p1, %s903_s17, %s113_s22  }
   0x9   : > { %p975_p5 = por %p124_p2, %p123_p0  ;;  %p979_p6 = por %p130_p4, %p129_p3 }
   0xa   : > { %p712_p7 = scmp.ge.s32.totalorder %s907_s18, 1  ;;  %p165_p8 = scmp.lt.s32.totalorder %s907_s18, 3 }
   0xc   : > { %p166_p9 = pnand %p712_p7, %p165_p8 }
   0xd   : > { %p191_p10 = scmp.lt.s32.totalorder (!%p166_p9), %s958_s19, 1  ;;  %s188_s8 = sand.u32 (!%p166_p9), 1, %s899_s16  }
   0xe   : > { %169 = sbr.rel (%p166_p9) target bundleno = 520 (0x208), region = 36  ;;  %s713_s9 = sshll.u32 (!%p166_p9), %s188_s8, 1 }
   0xf   : > { %s190_s11 = scalar_lea.vmem (!%p166_p9), [#allocation2], %s713_s9  ;;  %s911_s27 = smov (!%p166_p9), [#allocation2]  }
  0x10   : > { %s650_s12 = sshll.u32 (!%p166_p9), %s190_s11, 4  ;;  %s651_s12 = int_to_ptr.vmem [resolvable:$true] %s650_s12 }
  0x11   : > { %s847_s23 = scalar_lea.vmem (!%p166_p9), %s651_s12, 32 }
  0x12   : > { %p848_p11 = scmp.ne.s32.totalorder (!%p166_p9), %s651_s12, %s847_s23 }
  0x13   : > { %v716_v0 = vld.sshfl [vmem:[%s1194_s1] sm:$0x33 pattern:$0x76325410]  ;;  %vm327_vm0 = vcmask 1041408   ;;  %v909_v3 = vmov 0  }
  0x14   : > { %v312_v1 = vcombine.high %v716_v0, %v716_v0  ;;  %v329_v2 = vsel %vm327_vm0, %v716_v0, 0  ;;  %366 = vmatprep.mubr.bf16.mxu0 %v909_v3  ;;  %v799_v4 = vld [vmem:[%s1196_s3 + $0x74] ss:$8 sps:$4 sm:$0xff]   ;;  %v801_v5 = vld [vmem:[%s1196_s3 + $0x70] ss:$8 sps:$4 sm:$0xff]   ;;  %s192_s7 = scalar_select %p191_p10, %s958_s19, 1 }
  0x15   : > { %v802_v6 = vld [vmem:[%s1196_s3 + $0x64] ss:$8 sps:$4 sm:$0xff]   ;;  %571 = vmatprep.subr.bf16.mxu1 %v799_v4  ;;  %vm229_vm1 = vcmask 31744   ;;  %v804_v7 = vld [vmem:[%s1196_s3 + $0x60] ss:$8 sps:$4 sm:$0xff]   ;;  %p849_p12 = pnand %p848_p11, %p975_p5 }
  0x16   : > { %717 = vmatprep.subr.msk.bf16.mxu0 %vm327_vm0, %v312_v1  ;;  %s756_s10 = sshll.u32 %s192_s7, 8  ;;  %572 = vmatpush1.bf16.msra.mxu1 %v801_v5  ;;  %v805_v8 = vld [vmem:[%s1196_s3 + $0x54] ss:$8 sps:$4 sm:$0xff]   ;;  %v807_v18 = vld [vmem:[%s1196_s3 + $0x50] ss:$8 sps:$4 sm:$0xff]  }
  0x17   : > { %349 = vmatpush1.bf16.msra.mxu0 %v329_v2  ;;  %s1005_s20 = scalar_lea.vmem %s1193_s0, %s756_s10  ;;  %573 = vmatprep.subr.bf16.mxu1 %v802_v6  ;;  %v808_v20 = vld [vmem:[%s1196_s3 + $0x44] ss:$8 sps:$4 sm:$0xff]   ;;  %v810_v26 = vld [vmem:[%s1196_s3 + $0x40] ss:$8 sps:$4 sm:$0xff]   ;;  %v811_v34 = vld [vmem:[%s1196_s3 + $0x34] ss:$8 sps:$4 sm:$0xff]   ;;  %p850_p13 = pneg %p849_p12 }
  0x18   : > { %v197_v9 = vld [vmem:[%s1005_s20] sm:$0xff]  ;;  %v198_v10 = vld [vmem:[%s1005_s20 + $0x8] sm:$0xff]  ;;  %v199_v11 = vld [vmem:[%s1005_s20 + $0x10] sm:$0xff]  ;;  %s757_s10 = sshll.u32 %s958_s19, 5  ;;  %s851_s19 = sshll.u32 %s911_s27, 4  ;;  %s852_s19 = int_to_ptr.vmem [resolvable:$false] %s851_s19 }
  0x19   : > { %v200_v12 = vld [vmem:[%s1005_s20 + $0x18] sm:$0xff]  ;;  %v230_v13 = vsel %vm229_vm1, %v197_v9, 0.0  ;;  %v231_v14 = vsel %vm229_vm1, %v198_v10, 0.0  ;;  %v233_v15 = vsel %vm229_vm1, %v199_v11, 0.0  ;;  %v201_v16 = vld [vmem:[%s1005_s20 + $0x20] sm:$0xff]  ;;  %v202_v21 = vld [vmem:[%s1005_s20 + $0x28] sm:$0xff]  ;;  %s648_s22 = scalar_lea.hbm %s1197_s4, %s757_s10  ;;  %p854_p0 = scmp.lt.s32.totalorder %s651_s12, %s852_s19 }
  0x1a   : > { %v232_v17 = vadd.f32 %v231_v14, %v230_v13  ;;  %574 = vmatpush1.bf16.msra.mxu1 %v804_v7  ;;  %v235_v19 = vsel %vm229_vm1, %v200_v12, 0.0  ;;  %v237_v23 = vsel %vm229_vm1, %v201_v16, 0.0  ;;  %v203_v24 = vld [vmem:[%s1005_s20 + $0x30] sm:$0xff]  ;;  %v239_v27 = vsel %vm229_vm1, %v202_v21, 0.0  ;;  %v204_v28 = vld [vmem:[%s1005_s20 + $0x38] sm:$0xff]  ;;  %v205_v31 = vld [vmem:[%s1005_s20 + $0x40] sm:$0xff] }
  0x1b   : > { %575 = vmatprep.subr.bf16.mxu1 %v805_v8  ;;  %v241_v30 = vsel %vm229_vm1, %v203_v24, 0.0  ;;  %v243_v33 = vsel %vm229_vm1, %v204_v28, 0.0  ;;  %v813_v35 = vld [vmem:[%s1196_s3 + $0x30] ss:$8 sps:$4 sm:$0xff]   ;;  %v206_v36 = vld [vmem:[%s1005_s20 + $0x48] sm:$0xff]  ;;  %v245_v40 = vsel %vm229_vm1, %v205_v31, 0.0 }
  0x1c   : > { %v234_v22 = vadd.f32 %v233_v15, %v232_v17  ;;  %v814_v38 = vld [vmem:[%s1196_s3 + $0x24] ss:$8 sps:$4 sm:$0xff]   ;;  %v207_v39 = vld [vmem:[%s1005_s20 + $0x50] sm:$0xff]  ;;  %v816_v42 = vld [vmem:[%s1196_s3 + $0x20] ss:$8 sps:$4 sm:$0xff]   ;;  %v247_v43 = vsel %vm229_vm1, %v206_v36, 0.0 }
  0x1d   : > { %v817_v44 = vld [vmem:[%s1196_s3 + $0x14] ss:$8 sps:$4 sm:$0xff]   ;;  %v209_v47 = vld [vmem:[%s1005_s20 + $0x60] sm:$0xff]  ;;  %v249_v48 = vsel %vm229_vm1, %v207_v39, 0.0  ;;  %v819_v50 = vld [vmem:[%s1196_s3 + $0x10] ss:$8 sps:$4 sm:$0xff]  }
  0x1e   : > { %v236_v25 = vadd.f32 %v235_v19, %v234_v22  ;;  %576 = vmatpush1.bf16.msra.mxu1 %v807_v18  ;;  %v208_v45 = vld [vmem:[%s1005_s20 + $0x58] sm:$0xff]  ;;  %v820_v52 = vld [vmem:[%s1196_s3 + $0x4] ss:$8 sps:$4 sm:$0xff]   ;;  %v211_v55 = vld [vmem:[%s1005_s20 + $0x70] sm:$0xff]  ;;  %v253_v56 = vsel %vm229_vm1, %v209_v47, 0.0  ;;  %s853_s28 = scalar_lea.vmem %s852_s19, 64 }
  0x1f   : > { %577 = vmatprep.subr.bf16.mxu1 %v808_v20  ;;  %v251_v51 = vsel %vm229_vm1, %v208_v45, 0.0  ;;  %v210_v53 = vld [vmem:[%s1005_s20 + $0x68] sm:$0xff]  ;;  %v212_v59 = vld [vmem:[%s1005_s20 + $0x78] sm:$0xff]  ;;  %v257_v63 = vsel %vm229_vm1, %v211_v55, 0.0  ;;  %v213_v0 = vld [vmem:[%s1005_s20 + $0x80] sm:$0xff]  ;;  %p855_p1 = scmp.lt.s32.totalorder %s853_s28, %s847_s23 }
  0x20   : > { %v238_v29 = vadd.f32 %v237_v23, %v236_v25  ;;  %v822_v58 = vld [vmem:[%s1196_s3] ss:$8 sps:$4 sm:$0xff]   ;;  %v255_v60 = vsel %vm229_vm1, %v210_v53, 0.0  ;;  %v823_v61 = vld [vmem:[%s1196_s3 + $0xf4] ss:$8 sps:$4 sm:$0xff]   ;;  %v259_v3 = vsel %vm229_vm1, %v212_v59, 0.0 }
  0x21   : > { %v825_v2 = vld [vmem:[%s1196_s3 + $0xf0] ss:$8 sps:$4 sm:$0xff]   ;;  %v826_v4 = vld [vmem:[%s1196_s3 + $0xe4] ss:$8 sps:$4 sm:$0xff]   ;;  %v261_v7 = vsel %vm229_vm1, %v213_v0, 0.0  ;;  %p856_p2 = por %p855_p1, %p854_p0 }
  0x22   : > { %v240_v32 = vadd.f32 %v239_v27, %v238_v29  ;;  %578 = vmatpush1.bf16.msra.mxu1 %v810_v26  ;;  %v214_v5 = vld [vmem:[%s1005_s20 + $0x88] sm:$0xff]  ;;  %v215_v8 = vld [vmem:[%s1005_s20 + $0x90] sm:$0xff]  ;;  %v216_v13 = vld [vmem:[%s1005_s20 + $0x98] sm:$0xff] }
  0x23   : > { %579 = vmatprep.subr.bf16.mxu1 %v811_v34  ;;  %v828_v10 = vld [vmem:[%s1196_s3 + $0xe0] ss:$8 sps:$4 sm:$0xff]   ;;  %v263_v11 = vsel %vm229_vm1, %v214_v5, 0.0  ;;  %v829_v12 = vld [vmem:[%s1196_s3 + $0xd4] ss:$8 sps:$4 sm:$0xff]   ;;  %v265_v15 = vsel %vm229_vm1, %v215_v8, 0.0  ;;  %p857_p3 = pnand %p856_p2, %p850_p13 }
  0x24   : > { %v242_v37 = vadd.f32 %v241_v30, %v240_v32  ;;  %v217_v16 = vld [vmem:[%s1005_s20 + $0xa0] sm:$0xff]  ;;  %v831_v18 = vld [vmem:[%s1196_s3 + $0xd0] ss:$8 sps:$4 sm:$0xff]   ;;  %v267_v19 = vsel %vm229_vm1, %v216_v13, 0.0  ;;  %v218_v21 = vld [vmem:[%s1005_s20 + $0xa8] sm:$0xff] }
  0x25   : > { %v832_v20 = vld [vmem:[%s1196_s3 + $0xc4] ss:$8 sps:$4 sm:$0xff]   ;;  %v269_v23 = vsel %vm229_vm1, %v217_v16, 0.0  ;;  %v219_v24 = vld [vmem:[%s1005_s20 + $0xb0] sm:$0xff]  ;;  %v834_v26 = vld [vmem:[%s1196_s3 + $0xc0] ss:$8 sps:$4 sm:$0xff]  }
  0x26   : > { %v244_v41 = vadd.f32 %v243_v33, %v242_v37  ;;  %580 = vmatpush1.bf16.msra.mxu1 %v813_v35  ;;  %v271_v27 = vsel %vm229_vm1, %v218_v21, 0.0  ;;  %v835_v28 = vld [vmem:[%s1196_s3 + $0xb4] ss:$8 sps:$4 sm:$0xff]   ;;  %v273_v31 = vsel %vm229_vm1, %v219_v24, 0.0  ;;  %v221_v32 = vld [vmem:[%s1005_s20 + $0xc0] sm:$0xff]  ;;  %v222_v37 = vld [vmem:[%s1005_s20 + $0xc8] sm:$0xff] }
  0x27   : > { %581 = vmatprep.subr.bf16.mxu1 %v814_v38  ;;  %v220_v29 = vld [vmem:[%s1005_s20 + $0xb8] sm:$0xff]  ;;  %v838_v36 = vld [vmem:[%s1196_s3 + $0xa4] ss:$8 sps:$4 sm:$0xff]   ;;  %v277_v39 = vsel %vm229_vm1, %v221_v32, 0.0  ;;  %v227_v53 = vld [vmem:[%s1005_s20 + $0xf0] sm:$0xff] }
  0x28   : > { %v246_v46 = vadd.f32 %v245_v40, %v244_v41  ;;  %v837_v34 = vld [vmem:[%s1196_s3 + $0xb0] ss:$8 sps:$4 sm:$0xff]   ;;  %v275_v35 = vsel %vm229_vm1, %v220_v29, 0.0  ;;  %v225_v47 = vld [vmem:[%s1005_s20 + $0xe0] sm:$0xff] }
  0x29   : > { %v223_v40 = vld [vmem:[%s1005_s20 + $0xd0] sm:$0xff] }
  0x2a   : > { %v248_v49 = vadd.f32 %v247_v43, %v246_v46  ;;  %582 = vmatpush1.bf16.msra.mxu1 %v816_v42  ;;  %v840_v42 = vld [vmem:[%s1196_s3 + $0xa0] ss:$8 sps:$4 sm:$0xff]   ;;  %v279_v43 = vsel %vm229_vm1, %v222_v37, 0.0  ;;  %v281_v46 = vsel %vm229_vm1, %v223_v40, 0.0  ;;  %v843_v8 = vld [vmem:[%s1196_s3 + $0x90] ss:$8 sps:$4 sm:$0xff]  }
  0x2b   : > { %583 = vmatprep.subr.bf16.mxu1 %v817_v44  ;;  %v224_v44 = vld [vmem:[%s1005_s20 + $0xd8] sm:$0xff] }
  0x2c   : > { %v250_v54 = vadd.f32 %v249_v48, %v248_v49  ;;  %v283_v49 = vsel %vm229_vm1, %v224_v44, 0.0 }
  0x2e   : > { %v252_v57 = vadd.f32 %v251_v51, %v250_v54  ;;  %584 = vmatpush1.bf16.msra.mxu1 %v819_v50  ;;  %v226_v50 = vld [vmem:[%s1005_s20 + $0xe8] sm:$0xff] }
  0x2f   : > { %585 = vmatprep.subr.bf16.mxu1 %v820_v52  ;;  %v285_v52 = vsel %vm229_vm1, %v225_v47, 0.0  ;;  %v287_v55 = vsel %vm229_vm1, %v226_v50, 0.0 }
  0x30   : > { %v254_v62 = vadd.f32 %v253_v56, %v252_v57  ;;  %v228_v56 = vld [vmem:[%s1005_s20 + $0xf8] sm:$0xff]  ;;  %s636_s20 = scalar_lea.sflag [#allocation3], %s188_s8 }
  0x32   : > { %v256_v1 = vadd.f32 %v255_v60, %v254_v62  ;;  %586 = vmatpush1.bf16.msra.mxu1 %v822_v58  ;;  %v289_v58 = vsel %vm229_vm1, %v227_v53, 0.0  ;;  %v291_v60 = vsel %vm229_vm1, %v228_v56, 0.0 }
  0x33   : > { %587 = vmatprep.subr.bf16.mxu1 %v823_v61 }
  0x34   : > { %v258_v6 = vadd.f32 %v257_v63, %v256_v1 }
  0x36   : > { %v260_v9 = vadd.f32 %v259_v3, %v258_v6  ;;  %588 = vmatpush2.bf16.msra.mxu1 %v825_v2 }
  0x37   : > { %589 = vmatprep.subr.bf16.mxu1 %v826_v4 }
  0x38   : > { %v262_v14 = vadd.f32 %v261_v7, %v260_v9  ;;  %v841_v7 = vld [vmem:[%s1196_s3 + $0x94] ss:$8 sps:$4 sm:$0xff]   ;;  %v844_v9 = vld [vmem:[%s1196_s3 + $0x84] ss:$8 sps:$4 sm:$0xff]  }
  0x3a   : > { %v264_v17 = vadd.f32 %v263_v11, %v262_v14  ;;  %590 = vmatpush2.bf16.msra.mxu1 %v828_v10  ;;  %v846_v10 = vld [vmem:[%s1196_s3 + $0x80] ss:$8 sps:$4 sm:$0xff]   ;;  %v314_v11 = vlaneseq }
  0x3b   : > { %591 = vmatprep.subr.bf16.mxu1 %v829_v12  ;;  %v303_v14 = vld [vmem:[%s1195_s2] sm:$0x3] }
  0x3c   : > { %v266_v22 = vadd.f32 %v265_v15, %v264_v17  ;;  %v315_v12 = vshrl.u32 %v314_v11, 7  ;;  %vm632_vm2 = vcmp.lt.s32.totalorder %v314_v11, 256 }
  0x3e   : > { %v268_v25 = vadd.f32 %v267_v19, %v266_v22  ;;  %592 = vmatpush2.bf16.msra.mxu1 %v831_v18  ;;  %v316_v13 = vsub.s32 0, %v315_v12  ;;  %v320_v15 = vsub.s32 1, %v315_v12 }
  0x3f   : > { %593 = vmatprep.subr.bf16.mxu1 %v832_v20 }
  0x40   : > { %v270_v30 = vadd.f32 %v269_v23, %v268_v25  ;;  %v317_v16 = vrot.slane %v303_v14, %v316_v13  ;;  %v321_v17 = vrot.slane %v303_v14, %v320_v15 }
  0x42   : > { %v272_v33 = vadd.f32 %v271_v27, %v270_v30  ;;  %594 = vmatpush2.bf16.msra.mxu1 %v834_v26 }
  0x43   : > { %595 = vmatprep.subr.bf16.mxu1 %v835_v28  ;;  %v910_v28 = vmov 1966171168  }
  0x44   : > { %v274_v38 = vadd.f32 %v273_v31, %v272_v33  ;;  %v616_v29 = vunpack.c.l.s4 %v910_v28 }
  0x46   : > { %v276_v41 = vadd.f32 %v275_v35, %v274_v38  ;;  %596 = vmatpush2.bf16.msra.mxu1 %v837_v34  ;;  %v617_v30 = vunpack.c.0.s8 %v616_v29 }
  0x47   : > { %597 = vmatprep.subr.bf16.mxu1 %v838_v36 }
  0x48   : > { %v278_v45 = vadd.f32 %v277_v39, %v276_v41  ;;  %v620_v32 = vsub.s32 %v617_v30, %v315_v12 }
  0x4a   : > { %v280_v48 = vadd.f32 %v279_v43, %v278_v45  ;;  %598 = vmatpush2.bf16.msra.mxu1 %v840_v42 }
  0x4b   : > { %599 = vmatprep.subr.bf16.mxu1 %v841_v7 }
  0x4c   : > { %v282_v51 = vadd.f32 %v281_v46, %v280_v48 }
  0x4e   : > { %v284_v54 = vadd.f32 %v283_v49, %v282_v51  ;;  %600 = vmatpush2.bf16.msra.mxu1 %v843_v8 }
  0x4f   : > { %601 = vmatprep.subr.bf16.mxu1 %v844_v9 }
  0x50   : > { %v286_v57 = vadd.f32 %v285_v52, %v284_v54 }
  0x52   : > { %v288_v59 = vadd.f32 %v287_v55, %v286_v57  ;;  %602 = vmatpush2.bf16.msra.mxu1 %v846_v10 }
  0x54   : > { %v290_v61 = vadd.f32 %v289_v58, %v288_v59 }
  0x56   : > { %v292_v62 = vadd.f32 %v291_v60, %v290_v61 }
  0x58   : > { %v293_v63 = vrot.slane %v292_v62, 4 }
  0x5a   : > { %v294_v0 = vadd.f32 %v293_v63, %v292_v62 }
  0x5c   : > { %v295_v1 = vrot.slane %v294_v0, 2 }
  0x5e   : > { %v296_v2 = vadd.f32 %v295_v1, %v294_v0 }
  0x60   : > { %v297_v3 = vrot.slane %v296_v2, 1 }
  0x62   : > { %v298_v4 = vadd.f32 %v297_v3, %v296_v2 }
  0x64   : > { %v300_v5 = vmul.f32 0.00390625, %v298_v4 }
  0x66   : > { %v301_v6 = vpack.c.bf16 %v300_v5, %v300_v5 }
  0x68   : > { %718 = vmatmul.mubr.msk.bf16.vlgmr.msra.gmra.mxu0 %vm229_vm1, %v301_v6 }
 0x128   : > { %v368_v18 = vpop.f32.mrf.mxu0 }
 0x129   : > { %v369_v19 = vadd.f32 %v368_v18, %v317_v16 }
 0x12a   : > { %v370_v20 = vpop.f32.mrf.mxu0 }
 0x12b   : > { %v371_v21 = vadd.f32 %v370_v20, %v321_v17  ;;  %v375_v22 = vmax.f32 %v369_v19, 0.0 }
 0x12c   : > { %v372_v23 = vpop.f32.mrf.mxu0 }
 0x12d   : > { %v376_v24 = vmax.f32 %v371_v21, 0.0  ;;  %v377_v27 = vpack.c.bf16 %v375_v22, %v375_v22 }
 0x12e   : > { %v373_v25 = vpop.f32.mrf.mxu0 }
 0x12f   : > { %v378_v26 = vpack.c.bf16 %v376_v24, %v376_v24 }
 0x131   : > { %603 = vmatprep.mubr.bf16.mxu1 %v378_v26 }
 0x132   : > { %604 = vmatmul.mubr.bf16.vlgmr.msra.gmra.mxu1 %v377_v27 }
 0x1f2   : > { %v605_v31 = vpop.f32.mrf.mxu1 }
 0x1f4   : > { %v607_v33 = vpop.f32.mrf.mxu1 }
 0x1f5   : > { %v614_v34 = vcombine.low %v605_v31, %v607_v33 }
 0x1f6   : > { %v609_v35 = vpop.f32.mrf.mxu1 }
 0x1f7   : > { %v621_v36 = vrot.slane %v614_v34, %v620_v32 }
 0x1f8   : > { %v610_v37 = vpop.f32.mrf.mxu1 }
 0x1f9   : > { %v628_v38 = vrot.slane %v621_v36, %v620_v32 }
 0x1fb   : > { %634 = vst.msk [vmem:[%s190_s11] sm:$0x3] %vm632_vm2, %v628_v38 }
 0x1fc   : > { %860 = shalt.err (!%p857_p3)
}
 0x1fd   : > { %s861_s29 = scalar_lea.hbm %s648_s22, 32  ;;  %s865_s6 = scalar_lea.hbm %s1197_s4, 64 }
 0x1fe   : > { %p862_p4 = scmp.ne.s32.totalorder %s648_s22, %s861_s29  ;;  %p866_p9 = scmp.lt.s32.totalorder %s648_s22, %s1197_s4 }
 0x1ff   : > { %p867_p10 = scmp.lt.s32.totalorder %s865_s6, %s861_s29 }
 0x200   : > { %p863_p7 = pnand %p862_p4, %p975_p5 }
 0x201   : > { %p868_p11 = por %p867_p10, %p866_p9 }
 0x202   : > { %p864_p8 = pneg %p863_p7 }
 0x204   : > { %p869_p12 = pnand %p868_p11, %p864_p8 }
 0x206   : > { %872 = shalt.err (!%p869_p12)
}
 0x207   : > { %758 = dma.vmem_to_hbm [thread:$0]  (%p975_p5), %s651_s12, 32, %s648_s22, %s636_s20  }
 0x208 PF: > { %p764_p13 = scmp.ge.s32.totalorder %s907_s18, 2  ;;  %s662_s9 = sand.u32 1, %s895_s15  }
 0x209   : > { %s663_s10 = scalar_lea.sflag [#allocation3], %s662_s9 }
 0x20a   : > { %p761_p0 = pnand %p764_p13, %p979_p6 }
 0x20c   : > { %p762_p1 = pneg %p761_p0 }
 0x20e   : > { %890 = dma.done.wait (%p762_p1), %s663_s10, 32  }
 0x20f   : > { %892 = vsyncadd (%p762_p1), %s663_s10, 4294967264  ;;  %p14_p2 = scmp.ge.s32.totalorder %s962_s21, 4   ;;  %s1200_s15 = smov %s899_s16 }
 0x210   : > { %s1201_s16 = smov %s903_s17  ;;  %s1202_s17 = smov %s973_s24 }
 0x211   : > { %s1203_s18 = smov %s962_s21  ;;  %16 = sbr.rel (!%p14_p2) target bundleno = 3 (0x3), region = 71 }
 0x216   :  { %668 = vsyncpa [#allocation3], 1 }
 0x217   :  { %670 = vsyncpa [#allocation3 + $0x1], 1 }

</bundles_post_ra>
